<compile_context>
chip_gen: v7x
topology: tpu7x:2x2x1
jax: 0.10.0
libtpu: 0.0.40
codegen_flags: <defaults>
</compile_context>

<pallas_src>
import functools
import math

import jax
import jax.numpy as jnp
import numpy as np
from jax.experimental import pallas as pl
from jax.experimental.pallas import tpu as pltpu


def gcn_kernel(x_ref, w_ref, a_ref, b_ref, o_ref, *, K, C_out):
    """One grid step = one lane slab of L flattened (n, t, v) positions.

    Block shapes:
      x_ref: (C_in, L)        -- lane-dense input slab
      w_ref: (K*C_out, C_in)  -- all conv weights (K fused), resident
      a_ref: (K, L, L)        -- block-diagonal adjacency kron(I, A[k]), resident
      b_ref: (C_out, L)       -- bias pushed through A, resident
      o_ref: (C_out, L)       -- lane-dense output slab (L % 128 == 0 -> unmasked vst)
    """
    x2 = x_ref[...]                                              # (C_in, L)
    w = w_ref[...]                                               # (K*C_out, C_in)

    # Fused pointwise conv for all K adjacency slices: one MXU matmul, lane-dense.
    y = jnp.dot(w, x2, preferred_element_type=jnp.float32)       # (K*C_out, L)

    # Graph aggregation with block-diagonal A: lane-dense matmul per k,
    # no lane<->sublane relayouts.  Sublane slices are tile-aligned when
    # C_out % 8 == 0 (true here); K is tiny and static -> unrolled.
    acc = b_ref[...].astype(jnp.float32)                         # (C_out, L)
    for k in range(K):
        yk = y[k * C_out:(k + 1) * C_out, :]                     # (C_out, L)
        acc = acc + jnp.dot(yk, a_ref[k], preferred_element_type=jnp.float32)

    o_ref[...] = acc.astype(o_ref.dtype)


def _pick_lane_tile(total_lanes, V, max_lanes=512):
    """Pick a lane-slab width L and the padded lane total.

    Constraints: L is a multiple of lcm(128, V) (unmasked 128-lane stores AND whole
    V-blocks per slab so kron(I, A) is valid), L <= ~max_lanes (A_blk is O(L^2)
    VMEM, keep it v7x-friendly), and the padded total is a multiple of L.
    """
    base = (128 * V) // math.gcd(128, V)
    cap = max(base, (max_lanes // base) * base)

    # Prefer the largest valid L that divides total_lanes exactly (no padding).
    best = 0
    L = base
    while L <= min(total_lanes, cap):
        if total_lanes % L == 0:
            best = L
        L += base
    if best:
        return best, total_lanes

    # Otherwise pad the flattened lane axis up to a whole number of slabs.
    if total_lanes <= cap:
        L = ((total_lanes + base - 1) // base) * base
    else:
        L = cap
    padded = ((total_lanes + L - 1) // L) * L
    return L, padded


def graph_convolution(x, A, W, bias, *, max_lanes=512, compute_dtype=jnp.float32):
    """x:(N,C_in,T,V), A:(K,V,V), W:(K*C_out,C_in), bias:(K*C_out,) -> (N,C_out,T,V).

    compute_dtype=jnp.bfloat16 halves the HBM input stream on v6e/v7x (accumulation
    stays f32 via preferred_element_type); default f32 keeps tight tolerances.
    """
    N, C_in, T, V = x.shape
    K = A.shape[0]
    C_out = W.shape[0] // K

    x = x.astype(compute_dtype)
    A = A.astype(compute_dtype)
    W = W.astype(compute_dtype)
    bias = bias.astype(jnp.float32)

    total = N * T * V
    L, padded = _pick_lane_tile(total, V, max_lanes=max_lanes)
    n_steps = padded // L
    nrep = L // V

    # Lane-dense input: flatten (N, T, V) onto the lane axis, channels on sublanes.
    x2 = jnp.transpose(x, (1, 0, 2, 3)).reshape(C_in, total)
    if padded != total:
        x2 = jnp.pad(x2, ((0, 0), (0, padded - total)))

    # Block-diagonal adjacency: A_blk[k] = kron(I_nrep, A[k]).  Lets the in-kernel
    # aggregation contract over full 128+ lanes with zero reshapes.
    eye = jnp.eye(nrep, dtype=compute_dtype)
    A_blk = jnp.einsum('ij,kvw->kivjw', eye, A).reshape(K, L, L)

    # Fold the conv bias through the graph aggregation:
    #   bias contribution to out[c, (n,t), w] = sum_k b[k, c] * sum_v A[k, v, w]
    colsum = A.astype(jnp.float32).sum(axis=1)                          # (K, V)
    bias_cw = jnp.einsum('kc,kw->cw', bias.reshape(K, C_out), colsum)   # (C_out, V)
    bias_blk = jnp.tile(bias_cw, (1, nrep)).astype(jnp.float32)         # (C_out, L)

    kernel = functools.partial(gcn_kernel, K=K, C_out=C_out)

    # Estimated VMEM footprint (2x for double buffering on every operand) and an
    # explicit, generation-safe scoped-VMEM limit (v7x has only 64 MiB physical).
    bpe = jnp.dtype(compute_dtype).itemsize
    footprint = 2 * (
        C_in * L * bpe            # x slab
        + K * C_out * C_in * bpe  # W
        + K * L * L * bpe         # A_blk
        + C_out * L * 4           # bias
        + C_out * L * 4           # out slab
    )
    vmem_limit = int(min(48 * 2**20, max(32 * 2**20, 2 * footprint)))

    out2 = pl.pallas_call(
        kernel,
        out_shape=jax.ShapeDtypeStruct((C_out, padded), jnp.float32),
        grid_spec=pltpu.PrefetchScalarGridSpec(
            num_scalar_prefetch=0,
            grid=(n_steps,),
            in_specs=[
                pl.BlockSpec((C_in, L), lambda i: (0, i)),
                pl.BlockSpec((K * C_out, C_in), lambda i: (0, 0)),     # resident
                pl.BlockSpec((K, L, L), lambda i: (0, 0, 0)),          # resident
                pl.BlockSpec((C_out, L), lambda i: (0, 0)),            # resident
            ],
            out_specs=pl.BlockSpec((C_out, L), lambda i: (0, i)),
        ),
        compiler_params=pltpu.CompilerParams(
            dimension_semantics=("parallel",),
            vmem_limit_bytes=vmem_limit,
        ),
    )(x2, W, A_blk, bias_blk)

    out = out2[:, :total].reshape(C_out, N, T, V)
    return jnp.transpose(out, (1, 0, 2, 3))


def reference(x, A, W, bias):
    """Plain-JAX reference matching the PyTorch module exactly."""
    N, C_in, T, V = x.shape
    K = A.shape[0]
    C_out = W.shape[0] // K
    # 1x1 conv == channel matmul + bias
    y = jnp.einsum('oc,nctv->notv', W, x) + bias[None, :, None, None]  # (N, K*C_out, T, V)
    y = y.reshape(N, K, C_out, T, V)
    return jnp.einsum('nkctv,kvw->nctw', y, A)


if __name__ == "__main__":
    # Small deterministic shapes consistent with the module's forward.
    N, C_in, C_out, K, T, V = 2, 4, 8, 3, 8, 16

    key = jax.random.PRNGKey(0)
    kx, ka, kw, kb = jax.random.split(key, 4)
    x = jax.random.normal(kx, (N, C_in, T, V), dtype=jnp.float32)
    A = jax.random.normal(ka, (K, V, V), dtype=jnp.float32)
    # Conv2d weight shape is (C_out*K, C_in, 1, 1); we keep the squeezed (C_out*K, C_in).
    W = jax.random.normal(kw, (K * C_out, C_in), dtype=jnp.float32) * 0.1
    bias = jax.random.normal(kb, (K * C_out,), dtype=jnp.float32) * 0.1

    out = graph_convolution(x, A, W, bias)
    out = jax.block_until_ready(out)

    ref = jax.block_until_ready(reference(x, A, W, bias))
    np.testing.assert_allclose(np.asarray(out), np.asarray(ref), rtol=1e-4, atol=1e-4)

    print("KERNEL_OK")
</pallas_src>

<mosaic_0001>
module attributes {stable_mosaic.version = 11 : i64} {
  func.func @gcn_kernel(%arg0: i32, %arg1: memref<4x256xf32, #tpu.memory_space<vmem>>, %arg2: memref<24x4xf32, #tpu.memory_space<vmem>>, %arg3: memref<3x256x256xf32, #tpu.memory_space<vmem>>, %arg4: memref<8x256xf32, #tpu.memory_space<vmem>>, %arg5: memref<8x256xf32, #tpu.memory_space<vmem>>) attributes {dimension_semantics = [#tpu.dimension_semantics<parallel>], iteration_bounds = array<i64: 1>, scalar_prefetch = 0 : i64, scratch_operands = 0 : i64, tpu.core_type = #tpu.core_type<tc>, window_params = [{transform_indices = @transform_0, window_bounds = array<i64: 4, 256>}, {pipeline_mode = #tpu.pipeline_mode<synchronous>, transform_indices = @transform_1, window_bounds = array<i64: 24, 4>}, {pipeline_mode = #tpu.pipeline_mode<synchronous>, transform_indices = @transform_2, window_bounds = array<i64: 3, 256, 256>}, {pipeline_mode = #tpu.pipeline_mode<synchronous>, transform_indices = @transform_3, window_bounds = array<i64: 8, 256>}, {transform_indices = @transform_4, window_bounds = array<i64: 8, 256>}]} {
    %c0 = arith.constant 0 : index
    %c0_0 = arith.constant 0 : index
    %0 = vector.load %arg1[%c0, %c0_0] : memref<4x256xf32, #tpu.memory_space<vmem>>, vector<4x256xf32>
    %c0_1 = arith.constant 0 : index
    %c0_2 = arith.constant 0 : index
    %1 = vector.load %arg2[%c0_1, %c0_2] : memref<24x4xf32, #tpu.memory_space<vmem>>, vector<24x4xf32>
    %cst = arith.constant dense<0.000000e+00> : vector<24x256xf32>
    %2 = tpu.matmul %1, %0, %cst {dimension_numbers = #tpu.dot_dimension_numbers<[1], [0], [0], [1], [0, 0, 1, 1], [], []>} : vector<24x4xf32>, vector<4x256xf32>, vector<24x256xf32> -> vector<24x256xf32>
    %c0_3 = arith.constant 0 : index
    %c0_4 = arith.constant 0 : index
    %3 = vector.load %arg4[%c0_3, %c0_4] : memref<8x256xf32, #tpu.memory_space<vmem>>, vector<8x256xf32>
    %4 = vector.extract_strided_slice %2 {offsets = [0, 0], sizes = [8, 256], strides = [1, 1]} : vector<24x256xf32> to vector<8x256xf32>
    %c0_5 = arith.constant 0 : index
    %c0_6 = arith.constant 0 : index
    %c0_7 = arith.constant 0 : index
    %5 = vector.load %arg3[%c0_5, %c0_6, %c0_7] : memref<3x256x256xf32, #tpu.memory_space<vmem>>, vector<1x256x256xf32>
    %6 = vector.shape_cast %5 : vector<1x256x256xf32> to vector<256x256xf32>
    %cst_8 = arith.constant dense<0.000000e+00> : vector<8x256xf32>
    %7 = tpu.matmul %4, %6, %cst_8 {dimension_numbers = #tpu.dot_dimension_numbers<[1], [0], [0], [1], [0, 0, 1, 1], [], []>} : vector<8x256xf32>, vector<256x256xf32>, vector<8x256xf32> -> vector<8x256xf32>
    %8 = arith.addf %3, %7 : vector<8x256xf32>
    %9 = vector.extract_strided_slice %2 {offsets = [8, 0], sizes = [8, 256], strides = [1, 1]} : vector<24x256xf32> to vector<8x256xf32>
    %c1 = arith.constant 1 : index
    %c0_9 = arith.constant 0 : index
    %c0_10 = arith.constant 0 : index
    %10 = vector.load %arg3[%c1, %c0_9, %c0_10] : memref<3x256x256xf32, #tpu.memory_space<vmem>>, vector<1x256x256xf32>
    %11 = vector.shape_cast %10 : vector<1x256x256xf32> to vector<256x256xf32>
    %cst_11 = arith.constant dense<0.000000e+00> : vector<8x256xf32>
    %12 = tpu.matmul %9, %11, %cst_11 {dimension_numbers = #tpu.dot_dimension_numbers<[1], [0], [0], [1], [0, 0, 1, 1], [], []>} : vector<8x256xf32>, vector<256x256xf32>, vector<8x256xf32> -> vector<8x256xf32>
    %13 = arith.addf %8, %12 : vector<8x256xf32>
    %14 = vector.extract_strided_slice %2 {offsets = [16, 0], sizes = [8, 256], strides = [1, 1]} : vector<24x256xf32> to vector<8x256xf32>
    %c2 = arith.constant 2 : index
    %c0_12 = arith.constant 0 : index
    %c0_13 = arith.constant 0 : index
    %15 = vector.load %arg3[%c2, %c0_12, %c0_13] : memref<3x256x256xf32, #tpu.memory_space<vmem>>, vector<1x256x256xf32>
    %16 = vector.shape_cast %15 : vector<1x256x256xf32> to vector<256x256xf32>
    %cst_14 = arith.constant dense<0.000000e+00> : vector<8x256xf32>
    %17 = tpu.matmul %14, %16, %cst_14 {dimension_numbers = #tpu.dot_dimension_numbers<[1], [0], [0], [1], [0, 0, 1, 1], [], []>} : vector<8x256xf32>, vector<256x256xf32>, vector<8x256xf32> -> vector<8x256xf32>
    %18 = arith.addf %13, %17 : vector<8x256xf32>
    %c0_15 = arith.constant 0 : index
    %c0_16 = arith.constant 0 : index
    %19 = vector.load %arg5[%c0_15, %c0_16] : memref<8x256xf32, #tpu.memory_space<vmem>>, vector<8x256xf32>
    tpu.vector_store %arg5[%c0_15, %c0_16], %18 {strides = array<i32>} : memref<8x256xf32, #tpu.memory_space<vmem>>, vector<8x256xf32>,
    return
  }
  func.func @transform_0(%arg0: i32) -> (i32, i32) {
    %c0_i32 = arith.constant 0 : i32
    %c0_i32_0 = arith.constant 0 : i32
    return %c0_i32, %arg0 : i32, i32
  }
  func.func @transform_1(%arg0: i32) -> (i32, i32) {
    %c0_i32 = arith.constant 0 : i32
    %c0_i32_0 = arith.constant 0 : i32
    %c0_i32_1 = arith.constant 0 : i32
    return %c0_i32, %c0_i32_0 : i32, i32
  }
  func.func @transform_2(%arg0: i32) -> (i32, i32, i32) {
    %c0_i32 = arith.constant 0 : i32
    %c0_i32_0 = arith.constant 0 : i32
    %c0_i32_1 = arith.constant 0 : i32
    %c0_i32_2 = arith.constant 0 : i32
    return %c0_i32, %c0_i32_0, %c0_i32_1 : i32, i32, i32
  }
  func.func @transform_3(%arg0: i32) -> (i32, i32) {
    %c0_i32 = arith.constant 0 : i32
    %c0_i32_0 = arith.constant 0 : i32
    %c0_i32_1 = arith.constant 0 : i32
    return %c0_i32, %c0_i32_0 : i32, i32
  }
  func.func @transform_4(%arg0: i32) -> (i32, i32) {
    %c0_i32 = arith.constant 0 : i32
    %c0_i32_0 = arith.constant 0 : i32
    return %c0_i32, %arg0 : i32, i32
  }
}

</mosaic_0001>

<bundles_post_ra>
// kernel: tpu_custom_call.1
= control target key start
LH: loop header
LB: loop body
LE: loop exit
PB: predicated region body
PF: predicated region fallthrough
CT: control target
= control target key end

     0   :  { %9 = vsyncpa [#allocation3], 0  ;;  %s903_s0 = inlined_call_operand.vmem [shape: f32[4,256], index: 0, kind: input, shape index: {}]   ;;  %s904_s1 = inlined_call_operand.vmem [shape: f32[24,4], index: 1, kind: input, shape index: {}]   ;;  %s905_s2 = inlined_call_operand.hbm [shape: f32[3,256,256], index: 2, kind: input, shape index: {}]   ;;  %s906_s3 = inlined_call_operand.vmem [shape: f32[8,256], index: 3, kind: input, shape index: {}]   ;;  %s907_s4 = inlined_call_operand.hbm [shape: f32[8,256], index: 4, kind: output, shape index: {}]  }
   0x1   :  { %10 = vsyncpa [#allocation4], 0  ;;  %s825_s15 = smov [#allocation2]   ;;  %s777_s19 = scalar_lea.hbm %s905_s2, 24576 }
   0x2   :  { %s20_s16 = sshll.u32 %s825_s15, 4  ;;  %p778_p0 = scmp.ne.s32.totalorder %s905_s2, %s777_s19  ;;  %s21_s16 = int_to_ptr.vmem [resolvable:$true] %s20_s16 }
   0x3   :  { %p781_p1 = scmp.lt.u32.totalorder %s777_s19, %s905_s2 }
   0x5   :  { %p783_p2 = pnand %p781_p1, %p778_p0 }
   0x7   :  { %786 = shalt.err (!%p783_p2)
}
   0x8   :  { %s787_s24 = scalar_lea.vmem %s21_s16, 24576  ;;  %p792_p4 = scmp.lt.s32.totalorder %s21_s16, %s21_s16 }
   0x9   :  { %p788_p3 = scmp.ne.s32.totalorder %s21_s16, %s787_s24  ;;  %p793_p5 = scmp.lt.s32.totalorder %s787_s24, %s787_s24 }
   0xb   :  { %p794_p6 = por %p793_p5, %p792_p4 }
   0xd   :  { %p795_p7 = pnand %p794_p6, %p788_p3 }
   0xf   :  { %798 = shalt.err (!%p795_p7)
}
  0x10   :  { %s826_s25 = smov 256   ;;  %s827_s26 = smov 16  }
  0x11   :  { %26 = dma.hbm_to_vmem [thread:$0]  %s905_s2, 24576, %s21_s16, [#allocation3], %s826_s25, %s826_s25, %s827_s26  }
  0x12   :  { %821 = dma.done.wait [#allocation3], 24576  }
  0x13   :  { %822 = vsyncadd [#allocation3], 4294942720  ;;  %v828_v0 = vmov 0.0   ;;  %v32_v1 = vld [vmem:[%s903_s0] sm:$0xff]  ;;  %vm48_vm0 = vcmask 1043456   ;;  %v139_v4 = vld [vmem:[#allocation2 + $0x8] sm:$0xff] }
  0x14   :  { %117 = vmatprep.mubr.f32.mxu0 %v828_v0  ;;  %v37_v2 = vcombine.high %v32_v1, %v32_v1  ;;  %v33_v3 = vld [vmem:[%s904_s1] sm:$0xff]  ;;  %v141_v5 = vld [vmem:[#allocation2 + $0x18] sm:$0xff]  ;;  %vm38_vm1 = vcmask 31744   ;;  %v140_v8 = vld [vmem:[#allocation2 + $0x10] sm:$0xff]  ;;  %s829_s12 = smov [#allocation5]  }
  0x15   :  { %v573_v6 = vpack.c.bf16 %v141_v5, %v139_v4  ;;  %v138_v7 = vld [vmem:[#allocation2] sm:$0xff]  ;;  %v277_v9 = vld [vmem:[#allocation2 + $0x208] sm:$0xff]  ;;  %v279_v11 = vld [vmem:[#allocation2 + $0x218] sm:$0xff]  ;;  %s559_s13 = sshll.u32 %s829_s12, 4  ;;  %s560_s13 = int_to_ptr.vmem [resolvable:$true] %s559_s13 }
  0x16   :  { %568 = vmatprep.subr.msk.mxu0 %vm48_vm0, %v37_v2  ;;  %v575_v10 = vpack.c.bf16 %v140_v8, %v138_v7  ;;  %v143_v12 = vld [vmem:[#allocation2 + $0x28] sm:$0xff]  ;;  %v145_v13 = vld [vmem:[#allocation2 + $0x38] sm:$0xff]  ;;  %v637_v15 = vpack.c.bf16 %v279_v11, %v277_v9  ;;  %v276_v17 = vld [vmem:[#allocation2 + $0x200] sm:$0xff]  ;;  %s799_s14 = scalar_lea.vmem %s560_s13, 256  ;;  %p804_p9 = scmp.lt.s32.totalorder %s560_s13, %s560_s13 }
  0x17   :  { %569 = vmatpush1.msk.msra.mxu0 %vm48_vm0, %v32_v1  ;;  %v34_v14 = vld [vmem:[%s904_s1 + $0x8] sm:$0xff]  ;;  %v577_v16 = vpack.c.bf16 %v145_v13, %v143_v12  ;;  %v278_v18 = vld [vmem:[#allocation2 + $0x210] sm:$0xff]  ;;  %v142_v19 = vld [vmem:[#allocation2 + $0x20] sm:$0xff]  ;;  %p800_p8 = scmp.ne.s32.totalorder %s560_s13, %s799_s14  ;;  %p805_p10 = scmp.lt.s32.totalorder %s799_s14, %s799_s14 }
  0x18   :  { %570 = vmatmul.mubr.msk.f32.vlgmr.msra.gmra.mrb[0].mxu0 %vm38_vm1, %v33_v3  ;;  %574 = vmatprep.subr.bf16.mxu0 %v573_v6  ;;  %v639_v20 = vpack.c.bf16 %v278_v18, %v276_v17  ;;  %v144_v21 = vld [vmem:[#allocation2 + $0x30] sm:$0xff]  ;;  %v281_v22 = vld [vmem:[#allocation2 + $0x228] sm:$0xff]  ;;  %v283_v23 = vld [vmem:[#allocation2 + $0x238] sm:$0xff] }
  0x19   :  { %123 = vmatprep.mubr.f32.mxu0 %v828_v0  ;;  %576 = vmatpush1.bf16.msra.mxu0 %v575_v10  ;;  %v579_v24 = vpack.c.bf16 %v144_v21, %v142_v19  ;;  %v641_v25 = vpack.c.bf16 %v283_v23, %v281_v22  ;;  %v147_v26 = vld [vmem:[#allocation2 + $0x48] sm:$0xff]  ;;  %v149_v27 = vld [vmem:[#allocation2 + $0x58] sm:$0xff]  ;;  %v280_v28 = vld [vmem:[#allocation2 + $0x220] sm:$0xff]  ;;  %p806_p11 = por %p805_p10, %p804_p9 }
  0x1a   :  { %638 = vmatprep.subr.bf16.mxu1 %v637_v15  ;;  %578 = vmatprep.subr.bf16.mxu0 %v577_v16  ;;  %v581_v29 = vpack.c.bf16 %v149_v27, %v147_v26  ;;  %v282_v30 = vld [vmem:[#allocation2 + $0x230] sm:$0xff]  ;;  %v146_v31 = vld [vmem:[#allocation2 + $0x40] sm:$0xff]  ;;  %v285_v34 = vld [vmem:[#allocation2 + $0x248] sm:$0xff] }
  0x1b   :  { %v148_v32 = vld [vmem:[#allocation2 + $0x50] sm:$0xff]  ;;  %640 = vmatpush1.bf16.msra.mxu1 %v639_v20  ;;  %v643_v33 = vpack.c.bf16 %v282_v30, %v280_v28  ;;  %v287_v35 = vld [vmem:[#allocation2 + $0x258] sm:$0xff]  ;;  %v151_v36 = vld [vmem:[#allocation2 + $0x68] sm:$0xff]  ;;  %p807_p12 = pnand %p806_p11, %p800_p8 }
  0x1c   :  { %571 = vmatmul.mubr.msk.f32.gmra.mrb[2].mxu0 %vm38_vm1, %v34_v14  ;;  %642 = vmatprep.subr.bf16.mxu1 %v641_v25  ;;  %v645_v37 = vpack.c.bf16 %v287_v35, %v285_v34  ;;  %v153_v38 = vld [vmem:[#allocation2 + $0x78] sm:$0xff]  ;;  %v284_v39 = vld [vmem:[#allocation2 + $0x240] sm:$0xff]  ;;  %v286_v40 = vld [vmem:[#allocation2 + $0x250] sm:$0xff]  ;;  %v583_v42 = vpack.c.bf16 %v148_v32, %v146_v31 }
  0x1d   :  { %129 = vmatprep.mubr.f32.mxu0 %v828_v0  ;;  %v35_v41 = vld [vmem:[%s904_s1 + $0x10] sm:$0xff]  ;;  %580 = vmatpush1.bf16.msra.mxu0 %v579_v24  ;;  %v289_v43 = vld [vmem:[#allocation2 + $0x268] sm:$0xff]  ;;  %v585_v44 = vpack.c.bf16 %v153_v38, %v151_v36  ;;  %v150_v45 = vld [vmem:[#allocation2 + $0x60] sm:$0xff]  ;;  %v647_v48 = vpack.c.bf16 %v286_v40, %v284_v39 }
  0x1e   :  { %582 = vmatprep.subr.bf16.mxu0 %v581_v29  ;;  %v152_v46 = vld [vmem:[#allocation2 + $0x70] sm:$0xff]  ;;  %v291_v47 = vld [vmem:[#allocation2 + $0x278] sm:$0xff]  ;;  %v155_v49 = vld [vmem:[#allocation2 + $0x88] sm:$0xff] }
  0x1f   :  { %644 = vmatpush1.bf16.msra.mxu1 %v643_v33  ;;  %v157_v50 = vld [vmem:[#allocation2 + $0x98] sm:$0xff]  ;;  %v649_v51 = vpack.c.bf16 %v291_v47, %v289_v43  ;;  %v288_v52 = vld [vmem:[#allocation2 + $0x260] sm:$0xff]  ;;  %v290_v53 = vld [vmem:[#allocation2 + $0x270] sm:$0xff]  ;;  %v587_v54 = vpack.c.bf16 %v152_v46, %v150_v45 }
  0x20   :  { %572 = vmatmul.mubr.msk.f32.gmra.mrb[4].mxu0 %vm38_vm1, %v35_v41  ;;  %646 = vmatprep.subr.bf16.mxu1 %v645_v37  ;;  %v293_v55 = vld [vmem:[#allocation2 + $0x288] sm:$0xff]  ;;  %v295_v56 = vld [vmem:[#allocation2 + $0x298] sm:$0xff]  ;;  %v589_v57 = vpack.c.bf16 %v157_v50, %v155_v49  ;;  %v154_v58 = vld [vmem:[#allocation2 + $0x80] sm:$0xff]  ;;  %v651_v60 = vpack.c.bf16 %v290_v53, %v288_v52 }
  0x21   :  { %584 = vmatpush1.bf16.msra.mxu0 %v583_v42  ;;  %v156_v59 = vld [vmem:[#allocation2 + $0x90] sm:$0xff]  ;;  %v159_v61 = vld [vmem:[#allocation2 + $0xa8] sm:$0xff]  ;;  %v161_v62 = vld [vmem:[#allocation2 + $0xb8] sm:$0xff]  ;;  %v653_v63 = vpack.c.bf16 %v295_v56, %v293_v55 }
  0x22   :  { %586 = vmatprep.subr.bf16.mxu0 %v585_v44  ;;  %v292_v0 = vld [vmem:[#allocation2 + $0x280] sm:$0xff]  ;;  %v294_v1 = vld [vmem:[#allocation2 + $0x290] sm:$0xff]  ;;  %v591_v2 = vpack.c.bf16 %v156_v59, %v154_v58  ;;  %v297_v3 = vld [vmem:[#allocation2 + $0x2a8] sm:$0xff]  ;;  %v593_v5 = vpack.c.bf16 %v161_v62, %v159_v61 }
  0x23   :  { %648 = vmatpush1.bf16.msra.mxu1 %v647_v48  ;;  %v299_v4 = vld [vmem:[#allocation2 + $0x2b8] sm:$0xff]  ;;  %v158_v6 = vld [vmem:[#allocation2 + $0xa0] sm:$0xff]  ;;  %v160_v7 = vld [vmem:[#allocation2 + $0xb0] sm:$0xff]  ;;  %v655_v8 = vpack.c.bf16 %v294_v1, %v292_v0 }
  0x24   :  { %650 = vmatprep.subr.bf16.mxu1 %v649_v51  ;;  %v163_v9 = vld [vmem:[#allocation2 + $0xc8] sm:$0xff]  ;;  %v165_v10 = vld [vmem:[#allocation2 + $0xd8] sm:$0xff]  ;;  %v657_v11 = vpack.c.bf16 %v299_v4, %v297_v3  ;;  %v296_v12 = vld [vmem:[#allocation2 + $0x2a0] sm:$0xff]  ;;  %v595_v14 = vpack.c.bf16 %v160_v7, %v158_v6 }
  0x25   :  { %588 = vmatpush1.bf16.msra.mxu0 %v587_v54  ;;  %v298_v13 = vld [vmem:[#allocation2 + $0x2b0] sm:$0xff]  ;;  %v301_v15 = vld [vmem:[#allocation2 + $0x2c8] sm:$0xff]  ;;  %v303_v16 = vld [vmem:[#allocation2 + $0x2d8] sm:$0xff]  ;;  %v597_v17 = vpack.c.bf16 %v165_v10, %v163_v9 }
  0x26   :  { %590 = vmatprep.subr.bf16.mxu0 %v589_v57  ;;  %v162_v18 = vld [vmem:[#allocation2 + $0xc0] sm:$0xff]  ;;  %v164_v19 = vld [vmem:[#allocation2 + $0xd0] sm:$0xff]  ;;  %v659_v20 = vpack.c.bf16 %v298_v13, %v296_v12  ;;  %v167_v21 = vld [vmem:[#allocation2 + $0xe8] sm:$0xff]  ;;  %v661_v23 = vpack.c.bf16 %v303_v16, %v301_v15 }
  0x27   :  { %652 = vmatpush1.bf16.msra.mxu1 %v651_v60  ;;  %v169_v22 = vld [vmem:[#allocation2 + $0xf8] sm:$0xff]  ;;  %v300_v24 = vld [vmem:[#allocation2 + $0x2c0] sm:$0xff]  ;;  %v302_v25 = vld [vmem:[#allocation2 + $0x2d0] sm:$0xff]  ;;  %v599_v26 = vpack.c.bf16 %v164_v19, %v162_v18 }
  0x28   :  { %654 = vmatprep.subr.bf16.mxu1 %v653_v63  ;;  %v305_v27 = vld [vmem:[#allocation2 + $0x2e8] sm:$0xff]  ;;  %v307_v28 = vld [vmem:[#allocation2 + $0x2f8] sm:$0xff]  ;;  %v601_v29 = vpack.c.bf16 %v169_v22, %v167_v21  ;;  %v166_v30 = vld [vmem:[#allocation2 + $0xe0] sm:$0xff]  ;;  %v663_v32 = vpack.c.bf16 %v302_v25, %v300_v24 }
  0x29   :  { %592 = vmatpush1.bf16.msra.mxu0 %v591_v2  ;;  %v168_v31 = vld [vmem:[#allocation2 + $0xf0] sm:$0xff]  ;;  %v171_v33 = vld [vmem:[#allocation2 + $0x108] sm:$0xff]  ;;  %v173_v34 = vld [vmem:[#allocation2 + $0x118] sm:$0xff]  ;;  %v665_v35 = vpack.c.bf16 %v307_v28, %v305_v27 }
  0x2a   :  { %594 = vmatprep.subr.bf16.mxu0 %v593_v5  ;;  %v304_v36 = vld [vmem:[#allocation2 + $0x2e0] sm:$0xff]  ;;  %v306_v37 = vld [vmem:[#allocation2 + $0x2f0] sm:$0xff]  ;;  %v603_v38 = vpack.c.bf16 %v168_v31, %v166_v30  ;;  %v309_v39 = vld [vmem:[#allocation2 + $0x308] sm:$0xff]  ;;  %v605_v41 = vpack.c.bf16 %v173_v34, %v171_v33 }
  0x2b   :  { %656 = vmatpush1.bf16.msra.mxu1 %v655_v8  ;;  %v311_v40 = vld [vmem:[#allocation2 + $0x318] sm:$0xff]  ;;  %v170_v42 = vld [vmem:[#allocation2 + $0x100] sm:$0xff]  ;;  %v172_v43 = vld [vmem:[#allocation2 + $0x110] sm:$0xff]  ;;  %v667_v44 = vpack.c.bf16 %v306_v37, %v304_v36 }
  0x2c   :  { %658 = vmatprep.subr.bf16.mxu1 %v657_v11  ;;  %v175_v45 = vld [vmem:[#allocation2 + $0x128] sm:$0xff]  ;;  %v177_v46 = vld [vmem:[#allocation2 + $0x138] sm:$0xff]  ;;  %v669_v47 = vpack.c.bf16 %v311_v40, %v309_v39  ;;  %v308_v48 = vld [vmem:[#allocation2 + $0x300] sm:$0xff]  ;;  %v607_v50 = vpack.c.bf16 %v172_v43, %v170_v42 }
  0x2d   :  { %596 = vmatpush1.bf16.msra.mxu0 %v595_v14  ;;  %v310_v49 = vld [vmem:[#allocation2 + $0x310] sm:$0xff]  ;;  %v313_v51 = vld [vmem:[#allocation2 + $0x328] sm:$0xff]  ;;  %v315_v52 = vld [vmem:[#allocation2 + $0x338] sm:$0xff]  ;;  %v609_v53 = vpack.c.bf16 %v177_v46, %v175_v45 }
  0x2e   :  { %598 = vmatprep.subr.bf16.mxu0 %v597_v17  ;;  %v174_v54 = vld [vmem:[#allocation2 + $0x120] sm:$0xff]  ;;  %v176_v55 = vld [vmem:[#allocation2 + $0x130] sm:$0xff]  ;;  %v671_v56 = vpack.c.bf16 %v310_v49, %v308_v48  ;;  %v179_v57 = vld [vmem:[#allocation2 + $0x148] sm:$0xff]  ;;  %v673_v59 = vpack.c.bf16 %v315_v52, %v313_v51 }
  0x2f   :  { %660 = vmatpush1.bf16.msra.mxu1 %v659_v20  ;;  %v181_v58 = vld [vmem:[#allocation2 + $0x158] sm:$0xff]  ;;  %v312_v60 = vld [vmem:[#allocation2 + $0x320] sm:$0xff]  ;;  %v314_v61 = vld [vmem:[#allocation2 + $0x330] sm:$0xff]  ;;  %v611_v62 = vpack.c.bf16 %v176_v55, %v174_v54 }
  0x30   :  { %662 = vmatprep.subr.bf16.mxu1 %v661_v23  ;;  %v317_v63 = vld [vmem:[#allocation2 + $0x348] sm:$0xff]  ;;  %v319_v0 = vld [vmem:[#allocation2 + $0x358] sm:$0xff]  ;;  %v613_v1 = vpack.c.bf16 %v181_v58, %v179_v57  ;;  %v178_v2 = vld [vmem:[#allocation2 + $0x140] sm:$0xff]  ;;  %v675_v4 = vpack.c.bf16 %v314_v61, %v312_v60 }
  0x31   :  { %600 = vmatpush1.bf16.msra.mxu0 %v599_v26  ;;  %v180_v3 = vld [vmem:[#allocation2 + $0x150] sm:$0xff]  ;;  %v183_v5 = vld [vmem:[#allocation2 + $0x168] sm:$0xff]  ;;  %v185_v6 = vld [vmem:[#allocation2 + $0x178] sm:$0xff]  ;;  %v677_v7 = vpack.c.bf16 %v319_v0, %v317_v63 }
  0x32   :  { %602 = vmatprep.subr.bf16.mxu0 %v601_v29  ;;  %v316_v8 = vld [vmem:[#allocation2 + $0x340] sm:$0xff]  ;;  %v318_v9 = vld [vmem:[#allocation2 + $0x350] sm:$0xff]  ;;  %v615_v10 = vpack.c.bf16 %v180_v3, %v178_v2  ;;  %v321_v11 = vld [vmem:[#allocation2 + $0x368] sm:$0xff]  ;;  %v617_v13 = vpack.c.bf16 %v185_v6, %v183_v5 }
  0x33   :  { %664 = vmatpush1.bf16.msra.mxu1 %v663_v32  ;;  %v323_v12 = vld [vmem:[#allocation2 + $0x378] sm:$0xff]  ;;  %v182_v14 = vld [vmem:[#allocation2 + $0x160] sm:$0xff]  ;;  %v184_v15 = vld [vmem:[#allocation2 + $0x170] sm:$0xff]  ;;  %v679_v16 = vpack.c.bf16 %v318_v9, %v316_v8 }
  0x34   :  { %666 = vmatprep.subr.bf16.mxu1 %v665_v35  ;;  %v187_v17 = vld [vmem:[#allocation2 + $0x188] sm:$0xff]  ;;  %v189_v18 = vld [vmem:[#allocation2 + $0x198] sm:$0xff]  ;;  %v681_v19 = vpack.c.bf16 %v323_v12, %v321_v11  ;;  %v320_v20 = vld [vmem:[#allocation2 + $0x360] sm:$0xff]  ;;  %v619_v22 = vpack.c.bf16 %v184_v15, %v182_v14 }
  0x35   :  { %604 = vmatpush1.bf16.msra.mxu0 %v603_v38  ;;  %v322_v21 = vld [vmem:[#allocation2 + $0x370] sm:$0xff]  ;;  %v325_v23 = vld [vmem:[#allocation2 + $0x388] sm:$0xff]  ;;  %v327_v24 = vld [vmem:[#allocation2 + $0x398] sm:$0xff]  ;;  %v621_v25 = vpack.c.bf16 %v189_v18, %v187_v17 }
  0x36   :  { %606 = vmatprep.subr.bf16.mxu0 %v605_v41  ;;  %v186_v26 = vld [vmem:[#allocation2 + $0x180] sm:$0xff]  ;;  %v188_v27 = vld [vmem:[#allocation2 + $0x190] sm:$0xff]  ;;  %v683_v28 = vpack.c.bf16 %v322_v21, %v320_v20  ;;  %v191_v29 = vld [vmem:[#allocation2 + $0x1a8] sm:$0xff]  ;;  %v685_v31 = vpack.c.bf16 %v327_v24, %v325_v23 }
  0x37   :  { %668 = vmatpush1.bf16.msra.mxu1 %v667_v44  ;;  %v193_v30 = vld [vmem:[#allocation2 + $0x1b8] sm:$0xff]  ;;  %v324_v32 = vld [vmem:[#allocation2 + $0x380] sm:$0xff]  ;;  %v326_v33 = vld [vmem:[#allocation2 + $0x390] sm:$0xff]  ;;  %v623_v34 = vpack.c.bf16 %v188_v27, %v186_v26 }
  0x38   :  { %670 = vmatprep.subr.bf16.mxu1 %v669_v47  ;;  %v329_v35 = vld [vmem:[#allocation2 + $0x3a8] sm:$0xff]  ;;  %v331_v36 = vld [vmem:[#allocation2 + $0x3b8] sm:$0xff]  ;;  %v625_v37 = vpack.c.bf16 %v193_v30, %v191_v29  ;;  %v190_v38 = vld [vmem:[#allocation2 + $0x1a0] sm:$0xff]  ;;  %v687_v40 = vpack.c.bf16 %v326_v33, %v324_v32 }
  0x39   :  { %608 = vmatpush1.bf16.msra.mxu0 %v607_v50  ;;  %v192_v39 = vld [vmem:[#allocation2 + $0x1b0] sm:$0xff]  ;;  %v195_v41 = vld [vmem:[#allocation2 + $0x1c8] sm:$0xff]  ;;  %v197_v42 = vld [vmem:[#allocation2 + $0x1d8] sm:$0xff]  ;;  %v689_v43 = vpack.c.bf16 %v331_v36, %v329_v35 }
  0x3a   :  { %610 = vmatprep.subr.bf16.mxu0 %v609_v53  ;;  %v328_v44 = vld [vmem:[#allocation2 + $0x3a0] sm:$0xff]  ;;  %v330_v45 = vld [vmem:[#allocation2 + $0x3b0] sm:$0xff]  ;;  %v627_v46 = vpack.c.bf16 %v192_v39, %v190_v38  ;;  %v333_v47 = vld [vmem:[#allocation2 + $0x3c8] sm:$0xff]  ;;  %v629_v49 = vpack.c.bf16 %v197_v42, %v195_v41 }
  0x3b   :  { %672 = vmatpush1.bf16.msra.mxu1 %v671_v56  ;;  %v335_v48 = vld [vmem:[#allocation2 + $0x3d8] sm:$0xff]  ;;  %v194_v50 = vld [vmem:[#allocation2 + $0x1c0] sm:$0xff]  ;;  %v196_v51 = vld [vmem:[#allocation2 + $0x1d0] sm:$0xff]  ;;  %v691_v52 = vpack.c.bf16 %v330_v45, %v328_v44 }
  0x3c   :  { %674 = vmatprep.subr.bf16.mxu1 %v673_v59  ;;  %v199_v53 = vld [vmem:[#allocation2 + $0x1e8] sm:$0xff]  ;;  %v201_v54 = vld [vmem:[#allocation2 + $0x1f8] sm:$0xff]  ;;  %v693_v55 = vpack.c.bf16 %v335_v48, %v333_v47  ;;  %v332_v56 = vld [vmem:[#allocation2 + $0x3c0] sm:$0xff]  ;;  %v631_v58 = vpack.c.bf16 %v196_v51, %v194_v50 }
  0x3d   :  { %612 = vmatpush1.bf16.msra.mxu0 %v611_v62  ;;  %v334_v57 = vld [vmem:[#allocation2 + $0x3d0] sm:$0xff]  ;;  %v633_v59 = vpack.c.bf16 %v201_v54, %v199_v53  ;;  %v198_v61 = vld [vmem:[#allocation2 + $0x1e0] sm:$0xff]  ;;  %v337_v0 = vld [vmem:[#allocation2 + $0x3e8] sm:$0xff] }
  0x3e   :  { %614 = vmatprep.subr.bf16.mxu0 %v613_v1  ;;  %v695_v60 = vpack.c.bf16 %v334_v57, %v332_v56  ;;  %v200_v62 = vld [vmem:[#allocation2 + $0x1f0] sm:$0xff]  ;;  %v339_v1 = vld [vmem:[#allocation2 + $0x3f8] sm:$0xff]  ;;  %v336_v3 = vld [vmem:[#allocation2 + $0x3e0] sm:$0xff] }
  0x3f   :  { %676 = vmatpush1.bf16.msra.mxu1 %v675_v4  ;;  %v635_v63 = vpack.c.bf16 %v200_v62, %v198_v61  ;;  %v697_v2 = vpack.c.bf16 %v339_v1, %v337_v0  ;;  %v338_v4 = vld [vmem:[#allocation2 + $0x3f0] sm:$0xff]  ;;  %v415_v6 = vld [vmem:[#allocation2 + $0x408] sm:$0xff]  ;;  %v414_v11 = vld [vmem:[#allocation2 + $0x400] sm:$0xff] }
  0x40   :  { %678 = vmatprep.subr.bf16.mxu1 %v677_v7  ;;  %v699_v5 = vpack.c.bf16 %v338_v4, %v336_v3  ;;  %v417_v7 = vld [vmem:[#allocation2 + $0x418] sm:$0xff]  ;;  %v416_v12 = vld [vmem:[#allocation2 + $0x410] sm:$0xff]  ;;  %v423_v21 = vld [vmem:[#allocation2 + $0x448] sm:$0xff] }
  0x41   :  { %616 = vmatpush1.bf16.msra.mxu0 %v615_v10  ;;  %v701_v8 = vpack.c.bf16 %v417_v7, %v415_v6  ;;  %v421_v14 = vld [vmem:[#allocation2 + $0x438] sm:$0xff]  ;;  %v420_v20 = vld [vmem:[#allocation2 + $0x430] sm:$0xff]  ;;  %v422_v26 = vld [vmem:[#allocation2 + $0x440] sm:$0xff] }
  0x42   :  { %618 = vmatprep.subr.bf16.mxu0 %v617_v13  ;;  %v419_v13 = vld [vmem:[#allocation2 + $0x428] sm:$0xff]  ;;  %v424_v27 = vld [vmem:[#allocation2 + $0x450] sm:$0xff]  ;;  %v429_v30 = vld [vmem:[#allocation2 + $0x478] sm:$0xff] }
  0x43   :  { %680 = vmatpush1.bf16.msra.mxu1 %v679_v16  ;;  %v703_v16 = vpack.c.bf16 %v416_v12, %v414_v11  ;;  %v705_v18 = vpack.c.bf16 %v421_v14, %v419_v13  ;;  %v427_v29 = vld [vmem:[#allocation2 + $0x468] sm:$0xff]  ;;  %v426_v33 = vld [vmem:[#allocation2 + $0x460] sm:$0xff]  ;;  %v433_v36 = vld [vmem:[#allocation2 + $0x498] sm:$0xff] }
  0x44   :  { %682 = vmatprep.subr.bf16.mxu1 %v681_v19  ;;  %v418_v19 = vld [vmem:[#allocation2 + $0x420] sm:$0xff]  ;;  %v713_v32 = vpack.c.bf16 %v429_v30, %v427_v29  ;;  %v431_v35 = vld [vmem:[#allocation2 + $0x488] sm:$0xff]  ;;  %v437_v42 = vld [vmem:[#allocation2 + $0x4b8] sm:$0xff] }
  0x45   :  { %620 = vmatpush1.bf16.msra.mxu0 %v619_v22  ;;  %v425_v22 = vld [vmem:[#allocation2 + $0x458] sm:$0xff]  ;;  %v707_v23 = vpack.c.bf16 %v420_v20, %v418_v19  ;;  %v717_v38 = vpack.c.bf16 %v433_v36, %v431_v35  ;;  %v430_v39 = vld [vmem:[#allocation2 + $0x480] sm:$0xff]  ;;  %v435_v41 = vld [vmem:[#allocation2 + $0x4a8] sm:$0xff] }
  0x46   :  { %622 = vmatprep.subr.bf16.mxu0 %v621_v25  ;;  %v709_v25 = vpack.c.bf16 %v425_v22, %v423_v21  ;;  %v721_v44 = vpack.c.bf16 %v437_v42, %v435_v41  ;;  %v434_v45 = vld [vmem:[#allocation2 + $0x4a0] sm:$0xff]  ;;  %v439_v47 = vld [vmem:[#allocation2 + $0x4c8] sm:$0xff]  ;;  %v441_v48 = vld [vmem:[#allocation2 + $0x4d8] sm:$0xff] }
  0x47   :  { %684 = vmatpush1.bf16.msra.mxu1 %v683_v28  ;;  %v725_v50 = vpack.c.bf16 %v441_v48, %v439_v47  ;;  %v438_v51 = vld [vmem:[#allocation2 + $0x4c0] sm:$0xff]  ;;  %v443_v53 = vld [vmem:[#allocation2 + $0x4e8] sm:$0xff]  ;;  %v445_v54 = vld [vmem:[#allocation2 + $0x4f8] sm:$0xff] }
  0x48   :  { %686 = vmatprep.subr.bf16.mxu1 %v685_v31  ;;  %v711_v31 = vpack.c.bf16 %v424_v27, %v422_v26  ;;  %v729_v56 = vpack.c.bf16 %v445_v54, %v443_v53  ;;  %v442_v57 = vld [vmem:[#allocation2 + $0x4e0] sm:$0xff]  ;;  %v448_v0 = vld [vmem:[#allocation2 + $0x510] sm:$0xff]  ;;  %v451_v1 = vld [vmem:[#allocation2 + $0x528] sm:$0xff] }
  0x49   :  { %624 = vmatpush1.bf16.msra.mxu0 %v623_v34  ;;  %v428_v34 = vld [vmem:[#allocation2 + $0x470] sm:$0xff]  ;;  %v455_v7 = vld [vmem:[#allocation2 + $0x548] sm:$0xff]  ;;  %v454_v11 = vld [vmem:[#allocation2 + $0x540] sm:$0xff] }
  0x4a   :  { %626 = vmatprep.subr.bf16.mxu0 %v625_v37  ;;  %v715_v37 = vpack.c.bf16 %v428_v34, %v426_v33  ;;  %v452_v6 = vld [vmem:[#allocation2 + $0x530] sm:$0xff]  ;;  %v459_v13 = vld [vmem:[#allocation2 + $0x568] sm:$0xff]  ;;  %v461_v14 = vld [vmem:[#allocation2 + $0x578] sm:$0xff] }
  0x4b   :  { %688 = vmatpush1.bf16.msra.mxu1 %v687_v40  ;;  %v432_v40 = vld [vmem:[#allocation2 + $0x490] sm:$0xff]  ;;  %v463_v19 = vld [vmem:[#allocation2 + $0x588] sm:$0xff]  ;;  %v465_v20 = vld [vmem:[#allocation2 + $0x598] sm:$0xff] }
  0x4c   :  { %690 = vmatprep.subr.bf16.mxu1 %v689_v43  ;;  %v719_v43 = vpack.c.bf16 %v432_v40, %v430_v39  ;;  %v456_v12 = vld [vmem:[#allocation2 + $0x550] sm:$0xff]  ;;  %v749_v22 = vpack.c.bf16 %v465_v20, %v463_v19  ;;  %v467_v26 = vld [vmem:[#allocation2 + $0x5a8] sm:$0xff]  ;;  %v469_v27 = vld [vmem:[#allocation2 + $0x5b8] sm:$0xff] }
  0x4d   :  { %628 = vmatpush1.bf16.msra.mxu0 %v627_v46  ;;  %v436_v46 = vld [vmem:[#allocation2 + $0x4b0] sm:$0xff]  ;;  %v753_v29 = vpack.c.bf16 %v469_v27, %v467_v26  ;;  %v466_v30 = vld [vmem:[#allocation2 + $0x5a0] sm:$0xff]  ;;  %v473_v33 = vld [vmem:[#allocation2 + $0x5d8] sm:$0xff] }
  0x4e   :  { %630 = vmatprep.subr.bf16.mxu0 %v629_v49  ;;  %v723_v49 = vpack.c.bf16 %v436_v46, %v434_v45  ;;  %v470_v36 = vld [vmem:[#allocation2 + $0x5c0] sm:$0xff]  ;;  %v477_v39 = vld [vmem:[#allocation2 + $0x5f8] sm:$0xff]  ;;  %v137_v48 = vld [vmem:[%s906_s3 + $0x8] sm:$0xff] }
  0x4f   :  { %692 = vmatpush1.bf16.msra.mxu1 %v691_v52  ;;  %v440_v52 = vld [vmem:[#allocation2 + $0x4d0] sm:$0xff]  ;;  %v474_v42 = vld [vmem:[#allocation2 + $0x5e0] sm:$0xff] }
  0x50   :  { %694 = vmatprep.subr.bf16.mxu1 %v693_v55  ;;  %v727_v55 = vpack.c.bf16 %v440_v52, %v438_v51  ;;  %v136_v47 = vld [vmem:[%s906_s3] sm:$0xff] }
  0x51   :  { %632 = vmatpush1.bf16.msra.mxu0 %v631_v58  ;;  %v444_v58 = vld [vmem:[#allocation2 + $0x4f0] sm:$0xff] }
  0x52   :  { %634 = vmatprep.subr.bf16.mxu0 %v633_v59  ;;  %v447_v59 = vld [vmem:[#allocation2 + $0x508] sm:$0xff]  ;;  %v731_v61 = vpack.c.bf16 %v444_v58, %v442_v57 }
  0x53   :  { %696 = vmatpush1.bf16.msra.mxu1 %v695_v60  ;;  %v449_v60 = vld [vmem:[#allocation2 + $0x518] sm:$0xff] }
  0x54   :  { %698 = vmatprep.subr.bf16.mxu1 %v697_v2  ;;  %v733_v62 = vpack.c.bf16 %v449_v60, %v447_v59  ;;  %v453_v2 = vld [vmem:[#allocation2 + $0x538] sm:$0xff] }
  0x55   :  { %636 = vmatpush1.bf16.msra.mxu0 %v635_v63  ;;  %v446_v63 = vld [vmem:[#allocation2 + $0x500] sm:$0xff]  ;;  %v737_v4 = vpack.c.bf16 %v453_v2, %v451_v1 }
  0x56   :  { %v735_v3 = vpack.c.bf16 %v448_v0, %v446_v63 }
  0x57   :  { %700 = vmatpush1.bf16.msra.mxu1 %v699_v5  ;;  %v450_v5 = vld [vmem:[#allocation2 + $0x520] sm:$0xff] }
  0x58   :  { %702 = vmatprep.subr.bf16.mxu1 %v701_v8  ;;  %v457_v8 = vld [vmem:[#allocation2 + $0x558] sm:$0xff] }
  0xeb   :  { %v119_v9 = vpop.f32.mrb[0].mxu0 }
  0xec   :  { %v121_v10 = vpop.f32.mrb[1].mxu0 }
  0xed   :  { %266 = vmatprep.mubr.f32.mxu0 %v121_v10  ;;  %v741_v10 = vpack.c.bf16 %v457_v8, %v455_v7 }
  0xee   :  { %267 = vmatmul.mubr.f32.vlgmr.msra.gmra.mrb[6].mxu0 %v119_v9  ;;  %v739_v9 = vpack.c.bf16 %v452_v6, %v450_v5 }
  0xef   :  { %v125_v15 = vpop.f32.mrb[2].mxu0 }
  0xf0   :  { %v127_v17 = vpop.f32.mrb[3].mxu0 }
  0xf1   :  { %404 = vmatprep.mubr.f32.mxu1 %v127_v17  ;;  %v458_v17 = vld [vmem:[#allocation2 + $0x560] sm:$0xff] }
  0xf2   :  { %405 = vmatmul.mubr.f32.vlgmr.msra.gmra.mrb[0].mxu1 %v125_v15  ;;  %v743_v15 = vpack.c.bf16 %v456_v12, %v454_v11 }
  0xf3   :  { %704 = vmatpush1.bf16.msra.mxu1 %v703_v16  ;;  %v882_v24 = vpop.f32.mrb[4].mxu0  ;;  %v745_v16 = vpack.c.bf16 %v461_v14, %v459_v13 }
  0xf4   :  { %706 = vmatprep.subr.bf16.mxu1 %v705_v18  ;;  %v133_v28 = vpop.f32.mrb[5].mxu0  ;;  %v460_v18 = vld [vmem:[#allocation2 + $0x570] sm:$0xff] }
  0xf5   :  { %542 = vmatprep.mubr.f32.mxu1 %v133_v28  ;;  %v747_v21 = vpack.c.bf16 %v460_v18, %v458_v17 }
  0xf7   :  { %708 = vmatpush1.bf16.msra.mxu1 %v707_v23  ;;  %v462_v23 = vld [vmem:[#allocation2 + $0x580] sm:$0xff] }
  0xf8   :  { %710 = vmatprep.subr.bf16.mxu1 %v709_v25  ;;  %v464_v25 = vld [vmem:[#allocation2 + $0x590] sm:$0xff] }
  0xf9   :  { %v751_v28 = vpack.c.bf16 %v464_v25, %v462_v23 }
  0xfb   :  { %712 = vmatpush1.bf16.msra.mxu1 %v711_v31  ;;  %v468_v31 = vld [vmem:[#allocation2 + $0x5b0] sm:$0xff] }
  0xfc   :  { %714 = vmatprep.subr.bf16.mxu1 %v713_v32  ;;  %v471_v32 = vld [vmem:[#allocation2 + $0x5c8] sm:$0xff]  ;;  %v755_v34 = vpack.c.bf16 %v468_v31, %v466_v30 }
  0xfd   :  { %v757_v35 = vpack.c.bf16 %v473_v33, %v471_v32 }
  0xff   :  { %716 = vmatpush1.bf16.msra.mxu1 %v715_v37  ;;  %v472_v37 = vld [vmem:[#allocation2 + $0x5d0] sm:$0xff] }
 0x100   :  { %718 = vmatprep.subr.bf16.mxu1 %v717_v38  ;;  %v475_v38 = vld [vmem:[#allocation2 + $0x5e8] sm:$0xff]  ;;  %v759_v40 = vpack.c.bf16 %v472_v37, %v470_v36 }
 0x101   :  { %v761_v41 = vpack.c.bf16 %v477_v39, %v475_v38 }
 0x103   :  { %720 = vmatpush1.bf16.msra.mxu1 %v719_v43  ;;  %v476_v43 = vld [vmem:[#allocation2 + $0x5f0] sm:$0xff] }
 0x104   :  { %722 = vmatprep.subr.bf16.mxu1 %v721_v44  ;;  %v763_v44 = vpack.c.bf16 %v476_v43, %v474_v42 }
 0x107   :  { %724 = vmatpush1.bf16.msra.mxu1 %v723_v49 }
 0x108   :  { %726 = vmatprep.subr.bf16.mxu1 %v725_v50 }
 0x10b   :  { %728 = vmatpush1.bf16.msra.mxu1 %v727_v55 }
 0x10c   :  { %730 = vmatprep.subr.bf16.mxu1 %v729_v56 }
 0x10f   :  { %732 = vmatpush1.bf16.msra.mxu1 %v731_v61 }
 0x110   :  { %734 = vmatprep.subr.bf16.mxu1 %v733_v62 }
 0x113   :  { %736 = vmatpush1.bf16.msra.mxu1 %v735_v3 }
 0x114   :  { %738 = vmatprep.subr.bf16.mxu1 %v737_v4 }
 0x117   :  { %740 = vmatpush1.bf16.msra.mxu1 %v739_v9 }
 0x118   :  { %742 = vmatprep.subr.bf16.mxu1 %v741_v10 }
 0x11b   :  { %744 = vmatpush1.bf16.msra.mxu1 %v743_v15 }
 0x11c   :  { %746 = vmatprep.subr.bf16.mxu1 %v745_v16 }
 0x11f   :  { %748 = vmatpush1.bf16.msra.mxu1 %v747_v21 }
 0x120   :  { %750 = vmatprep.subr.bf16.mxu1 %v749_v22 }
 0x123   :  { %752 = vmatpush1.bf16.msra.mxu1 %v751_v28 }
 0x124   :  { %754 = vmatprep.subr.bf16.mxu1 %v753_v29 }
 0x127   :  { %756 = vmatpush1.bf16.msra.mxu1 %v755_v34 }
 0x128   :  { %758 = vmatprep.subr.bf16.mxu1 %v757_v35 }
 0x12b   :  { %760 = vmatpush1.bf16.msra.mxu1 %v759_v40 }
 0x12c   :  { %762 = vmatprep.subr.bf16.mxu1 %v761_v41 }
 0x12f   :  { %764 = vmatpush1.bf16.msra.mxu1 %v763_v44 }
 0x132   :  { %543 = vmatmul.mubr.f32.vlgmr.msra.gmra.mrb[0].mxu1 %v882_v24 }
 0x1c1   :  { %v268_v45 = vpop.f32.mrb[6].mxu0 }
 0x1c2   :  { %v270_v46 = vpop.f32.mrb[7].mxu0  ;;  %v273_v49 = vadd.f32 %v268_v45, %v136_v47 }
 0x1c3   :  { %v274_v50 = vadd.f32 %v270_v46, %v137_v48 }
 0x205   :  { %v544_v51 = vpop.f32.mrb[0].mxu1 }
 0x206   :  { %v766_v52 = vadd.f32 %v544_v51, %v273_v49  ;;  %v546_v53 = vpop.f32.mrb[1].mxu1 }
 0x207   :  { %v768_v54 = vadd.f32 %v546_v53, %v274_v50 }
 0x208   :  { %551 = vst [vmem:[#allocation5] sm:$0xff] %v766_v52 }
 0x209   :  { %552 = vst [vmem:[#allocation5 + $0x8] sm:$0xff] %v768_v54 }
 0x20a   :  { %810 = shalt.err (!%p807_p12)
}
 0x20b   :  { %s811_s16 = scalar_lea.hbm %s907_s4, 256 }
 0x20c   :  { %p812_p13 = scmp.ne.s32.totalorder %s907_s4, %s811_s16  ;;  %p815_p0 = scmp.lt.u32.totalorder %s811_s16, %s907_s4 }
 0x20e   :  { %p817_p1 = pnand %p815_p0, %p812_p13 }
 0x210   :  { %820 = shalt.err (!%p817_p1)
}
 0x211   :  { %562 = dma.vmem_to_hbm [thread:$0]  %s560_s13, 256, %s907_s4, [#allocation4]  }
 0x212   :  { %823 = dma.done.wait [#allocation4], 256  }
 0x213   :  { %824 = vsyncadd [#allocation4], 4294967040 }
 0x214   :  { %566 = vsyncpa [#allocation3], 1 }
 0x215   :  { %567 = vsyncpa [#allocation4], 1 }

</bundles_post_ra>
